<compile_context>
chip_gen: v6e
topology: v6e:2x2x1
jax: 0.10.0
libtpu: 0.0.40
codegen_flags: <defaults>
</compile_context>

<pallas_src>
import jax
import jax.numpy as jnp
from jax.experimental import pallas as pl
from jax.experimental.pallas import tpu as pltpu

H_PAD = 128                      # hidden width (25) lane-padded to one 128-lane vreg
VMEM_LIMIT = 32 * 1024 * 1024    # explicit scoped-VMEM limit: >= v5e's 16 MiB default,
                                 # == v6e/v7x defaults, <= v7x's 64 MiB physical VMEM
VMEM_BUDGET = 24 * 1024 * 1024   # what the TB formula targets (headroom under VMEM_LIMIT)


def _round_up(n, m):
    return (n + m - 1) // m * m


def _pad_to(a, shape, dtype=None):
    pads = [(0, s - d) for d, s in zip(a.shape, shape)]
    out = jnp.pad(a, pads)
    return out.astype(dtype) if dtype is not None else out


def _choose_tb(batch, num_features):
    """Batch-tile rows, sized by VMEM bytes instead of a fixed row count.

    Per-row VMEM cost (f32 x, 3-deep x pipeline, lane-padded (TB,1) out column
    double-buffered, f32 h1/h2 temporaries):
        3*F*4  +  2*128*4  +  2*128*4   bytes.
    """
    per_row = 3 * num_features * 4 + 4 * H_PAD * 4
    tb = max(256, min(VMEM_BUDGET // per_row, 32768))
    tb = tb // 256 * 256
    if batch <= tb:
        if batch >= 1024:
            # Split into >=2 grid steps so a parallel batch axis can be spread
            # over both v7x TensorCores (one extra ~0.35us step elsewhere).
            return _round_up(-(-batch // 2), 256)
        return batch            # single block, exactly the array extent
    return tb


def mlp_kernel(x_ref, w1_ref, b1_ref, w2_ref, b2_ref, w3_ref, b3_ref, o_ref):
    # x arrives as f32 straight from HBM; the bf16 cast happens here (VPU) so
    # there is no separate wrapper-side cast pass over x in HBM.
    x = x_ref[...].astype(jnp.bfloat16)
    # Layer 1: bf16 MXU matmul, f32 accumulation; bias add + ReLU on the VPU.
    h1 = jnp.dot(x, w1_ref[...], preferred_element_type=jnp.float32)
    h1 = jnp.maximum(h1 + b1_ref[...], 0.0).astype(jnp.bfloat16)
    # Layer 2.
    h2 = jnp.dot(h1, w2_ref[...], preferred_element_type=jnp.float32)
    h2 = jnp.maximum(h2 + b2_ref[...], 0.0).astype(jnp.bfloat16)
    # Layer 3 (no activation).
    out = jnp.dot(h2, w3_ref[...], preferred_element_type=jnp.float32)
    # TODO(synk): a lane-dense (1, TB) output row would avoid the column's
    # masked stores / strided writeback, but it needs a sublane->lane relayout
    # of the (TB, 1) result that Mosaic does not reliably lower; with
    # H_PAD=128 these stores hide under the MXU slot, so the safe column
    # layout is kept. On v7x, pltpu.CORE_PARALLEL on the batch axis is the
    # remaining lever to engage both TensorCores.
    o_ref[...] = (out + b3_ref[...]).astype(o_ref.dtype)


@jax.jit
def mlp_regression_forward(x, w1, b1, w2, b2, w3, b3):
    """Forward pass of MLP_regression.

    x:  [B, F] float32
    w*: stored [in_features, out_features] (transposed from PyTorch [out, in])
    b*: stored [1, out_features]
    """
    B, F = x.shape
    o_dim = w3.shape[1]  # 1

    # Lane-pad the 25-wide hidden dims to 128. Zero weight columns + zero bias
    # lanes keep the padded lanes at exactly 0 through ReLU, so results match.
    w1p = _pad_to(w1, (F, H_PAD), jnp.bfloat16)
    b1p = _pad_to(b1, (1, H_PAD), jnp.float32)
    w2p = _pad_to(w2, (H_PAD, H_PAD), jnp.bfloat16)
    b2p = _pad_to(b2, (1, H_PAD), jnp.float32)
    w3p = _pad_to(w3, (H_PAD, o_dim), jnp.bfloat16)
    b3p = b3.astype(jnp.float32)

    # x goes in untouched (f32, unpadded): the ragged last block is handled by
    # Pallas masking, so no extra HBM pass over x is ever made in the wrapper.
    TB = _choose_tb(B, F)
    nsteps = pl.cdiv(B, TB)
    grid = (nsteps,)

    x_spec_kwargs = {}
    if nsteps >= 3:
        # Deeper pipeline on the only streamed operand to smooth HBM bursts.
        x_spec_kwargs["pipeline_mode"] = pl.Buffered(3)

    const = lambda i: (0, 0)  # weights/biases resident across the whole grid

    return pl.pallas_call(
        mlp_kernel,
        out_shape=jax.ShapeDtypeStruct((B, o_dim), jnp.float32),
        grid=grid,
        in_specs=[
            pl.BlockSpec((TB, F), lambda i: (i, 0), **x_spec_kwargs),  # x stream
            pl.BlockSpec((F, H_PAD), const),              # w1
            pl.BlockSpec((1, H_PAD), const),              # b1
            pl.BlockSpec((H_PAD, H_PAD), const),          # w2
            pl.BlockSpec((1, H_PAD), const),              # b2
            pl.BlockSpec((H_PAD, o_dim), const),          # w3
            pl.BlockSpec((1, o_dim), const),              # b3
        ],
        out_specs=pl.BlockSpec((TB, o_dim), lambda i: (i, 0)),
        compiler_params=pltpu.CompilerParams(
            dimension_semantics=("parallel",),
            vmem_limit_bytes=VMEM_LIMIT,
        ),
    )(x, w1p, b1p, w2p, b2p, w3p, b3p)


def init_params(key, num_features):
    """Deterministic init mirroring torch.nn.Linear (uniform(-1/sqrt(fan_in), +))."""

    def linear_init(k, fan_in, fan_out):
        kw, kb = jax.random.split(k)
        bound = 1.0 / jnp.sqrt(fan_in)
        # Stored as [in, out] so the kernel computes x @ W.
        w = jax.random.uniform(kw, (fan_in, fan_out), jnp.float32, -bound, bound)
        b = jax.random.uniform(kb, (1, fan_out), jnp.float32, -bound, bound)
        return w, b

    k1, k2, k3 = jax.random.split(key, 3)
    w1, b1 = linear_init(k1, num_features, 25)
    w2, b2 = linear_init(k2, 25, 25)
    w3, b3 = linear_init(k3, 25, 1)
    return w1, b1, w2, b2, w3, b3


def reference_forward_f32(x, w1, b1, w2, b2, w3, b3):
    h1 = jnp.maximum(x @ w1 + b1, 0.0)
    h2 = jnp.maximum(h1 @ w2 + b2, 0.0)
    return h2 @ w3 + b3


def reference_forward_bf16(x, w1, b1, w2, b2, w3, b3):
    """Same math as the kernel: bf16 matmul operands, f32 accumulation/bias."""
    bf16, f32 = jnp.bfloat16, jnp.float32
    h1 = jnp.maximum(
        jnp.dot(x.astype(bf16), w1.astype(bf16), preferred_element_type=f32) + b1, 0.0)
    h2 = jnp.maximum(
        jnp.dot(h1.astype(bf16), w2.astype(bf16), preferred_element_type=f32) + b2, 0.0)
    return jnp.dot(h2.astype(bf16), w3.astype(bf16), preferred_element_type=f32) + b3


if __name__ == "__main__":
    num_features = 32
    batch = 8

    key = jax.random.PRNGKey(0)
    kx, kp = jax.random.split(key)
    x = jax.random.normal(kx, (batch, num_features), jnp.float32)
    params = init_params(kp, num_features)

    out = jax.block_until_ready(mlp_regression_forward(x, *params))
    assert out.shape == (batch, 1)

    # Tight check vs a reference of the exact kernel math (bf16 operands, f32 acc).
    ref_bf16 = reference_forward_bf16(x, *params)
    assert jnp.allclose(out, ref_bf16, atol=1e-3, rtol=1e-3)

    # Loose check vs the pure-f32 module math (only bf16 operand rounding differs).
    ref_f32 = reference_forward_f32(x, *params)
    assert jnp.allclose(out, ref_f32, atol=5e-2, rtol=5e-2)

    print("KERNEL_OK")
</pallas_src>

<mosaic_0001>
module attributes {stable_mosaic.version = 11 : i64} {
  func.func @mlp_kernel(%arg0: i32, %arg1: memref<8x32xf32, #tpu.memory_space<vmem>>, %arg2: memref<32x128xbf16, #tpu.memory_space<vmem>>, %arg3: memref<1x128xf32, #tpu.memory_space<vmem>>, %arg4: memref<128x128xbf16, #tpu.memory_space<vmem>>, %arg5: memref<1x128xf32, #tpu.memory_space<vmem>>, %arg6: memref<128x1xbf16, #tpu.memory_space<vmem>>, %arg7: memref<1x1xf32, #tpu.memory_space<vmem>>, %arg8: memref<8x1xf32, #tpu.memory_space<vmem>>) attributes {dimension_semantics = [#tpu.dimension_semantics<parallel>], iteration_bounds = array<i64: 1>, scalar_prefetch = 0 : i64, scratch_operands = 0 : i64, tpu.core_type = #tpu.core_type<tc>, window_params = [{transform_indices = @transform_0, window_bounds = array<i64: 8, 32>}, {pipeline_mode = #tpu.pipeline_mode<synchronous>, transform_indices = @transform_1, window_bounds = array<i64: 32, 128>}, {pipeline_mode = #tpu.pipeline_mode<synchronous>, transform_indices = @transform_2, window_bounds = array<i64: 1, 128>}, {pipeline_mode = #tpu.pipeline_mode<synchronous>, transform_indices = @transform_3, window_bounds = array<i64: 128, 128>}, {pipeline_mode = #tpu.pipeline_mode<synchronous>, transform_indices = @transform_4, window_bounds = array<i64: 1, 128>}, {pipeline_mode = #tpu.pipeline_mode<synchronous>, transform_indices = @transform_5, window_bounds = array<i64: 128, 1>}, {pipeline_mode = #tpu.pipeline_mode<synchronous>, transform_indices = @transform_6, window_bounds = array<i64: 1, 1>}, {transform_indices = @transform_7, window_bounds = array<i64: 8, 1>}]} {
    %c0 = arith.constant 0 : index
    %c0_0 = arith.constant 0 : index
    %0 = vector.load %arg1[%c0, %c0_0] : memref<8x32xf32, #tpu.memory_space<vmem>>, vector<8x32xf32>
    %1 = arith.truncf %0 : vector<8x32xf32> to vector<8x32xbf16>
    %c0_1 = arith.constant 0 : index
    %c0_2 = arith.constant 0 : index
    %2 = vector.load %arg2[%c0_1, %c0_2] : memref<32x128xbf16, #tpu.memory_space<vmem>>, vector<32x128xbf16>
    %cst = arith.constant dense<0.000000e+00> : vector<8x128xf32>
    %3 = tpu.matmul %1, %2, %cst {dimension_numbers = #tpu.dot_dimension_numbers<[1], [0], [0], [1], [0, 0, 1, 1], [], []>} : vector<8x32xbf16>, vector<32x128xbf16>, vector<8x128xf32> -> vector<8x128xf32>
    %c0_3 = arith.constant 0 : index
    %c0_4 = arith.constant 0 : index
    %4 = vector.load %arg3[%c0_3, %c0_4] : memref<1x128xf32, #tpu.memory_space<vmem>>, vector<1x128xf32>
    %5 = vector.broadcast %4 : vector<1x128xf32> to vector<8x128xf32>
    %6 = arith.addf %3, %5 : vector<8x128xf32>
    %cst_5 = arith.constant 0.000000e+00 : f32
    %7 = vector.broadcast %cst_5 : f32 to vector<8x128xf32>
    %8 = arith.maximumf %6, %7 : vector<8x128xf32>
    %9 = arith.truncf %8 : vector<8x128xf32> to vector<8x128xbf16>
    %c0_6 = arith.constant 0 : index
    %c0_7 = arith.constant 0 : index
    %10 = vector.load %arg4[%c0_6, %c0_7] : memref<128x128xbf16, #tpu.memory_space<vmem>>, vector<128x128xbf16>
    %cst_8 = arith.constant dense<0.000000e+00> : vector<8x128xf32>
    %11 = tpu.matmul %9, %10, %cst_8 {dimension_numbers = #tpu.dot_dimension_numbers<[1], [0], [0], [1], [0, 0, 1, 1], [], []>} : vector<8x128xbf16>, vector<128x128xbf16>, vector<8x128xf32> -> vector<8x128xf32>
    %c0_9 = arith.constant 0 : index
    %c0_10 = arith.constant 0 : index
    %12 = vector.load %arg5[%c0_9, %c0_10] : memref<1x128xf32, #tpu.memory_space<vmem>>, vector<1x128xf32>
    %13 = vector.broadcast %12 : vector<1x128xf32> to vector<8x128xf32>
    %14 = arith.addf %11, %13 : vector<8x128xf32>
    %cst_11 = arith.constant 0.000000e+00 : f32
    %15 = vector.broadcast %cst_11 : f32 to vector<8x128xf32>
    %16 = arith.maximumf %14, %15 : vector<8x128xf32>
    %17 = arith.truncf %16 : vector<8x128xf32> to vector<8x128xbf16>
    %c0_12 = arith.constant 0 : index
    %c0_13 = arith.constant 0 : index
    %18 = vector.load %arg6[%c0_12, %c0_13] : memref<128x1xbf16, #tpu.memory_space<vmem>>, vector<128x1xbf16>
    %cst_14 = arith.constant dense<0.000000e+00> : vector<8x1xf32>
    %19 = tpu.matmul %17, %18, %cst_14 {dimension_numbers = #tpu.dot_dimension_numbers<[1], [0], [0], [1], [0, 0, 1, 1], [], []>} : vector<8x128xbf16>, vector<128x1xbf16>, vector<8x1xf32> -> vector<8x1xf32>
    %c0_15 = arith.constant 0 : index
    %c0_16 = arith.constant 0 : index
    %20 = vector.load %arg7[%c0_15, %c0_16] : memref<1x1xf32, #tpu.memory_space<vmem>>, vector<1x1xf32>
    %21 = vector.broadcast %20 : vector<1x1xf32> to vector<8x1xf32>
    %22 = arith.addf %19, %21 : vector<8x1xf32>
    %c0_17 = arith.constant 0 : index
    %c0_18 = arith.constant 0 : index
    %23 = vector.load %arg8[%c0_17, %c0_18] : memref<8x1xf32, #tpu.memory_space<vmem>>, vector<8x1xf32>
    tpu.vector_store %arg8[%c0_17, %c0_18], %22 {strides = array<i32>} : memref<8x1xf32, #tpu.memory_space<vmem>>, vector<8x1xf32>,
    return
  }
  func.func @transform_0(%arg0: i32) -> (i32, i32) {
    %c0_i32 = arith.constant 0 : i32
    %c0_i32_0 = arith.constant 0 : i32
    return %arg0, %c0_i32 : i32, i32
  }
  func.func @transform_1(%arg0: i32) -> (i32, i32) {
    %c0_i32 = arith.constant 0 : i32
    %c0_i32_0 = arith.constant 0 : i32
    %c0_i32_1 = arith.constant 0 : i32
    return %c0_i32, %c0_i32_0 : i32, i32
  }
  func.func @transform_2(%arg0: i32) -> (i32, i32) {
    %c0_i32 = arith.constant 0 : i32
    %c0_i32_0 = arith.constant 0 : i32
    %c0_i32_1 = arith.constant 0 : i32
    return %c0_i32, %c0_i32_0 : i32, i32
  }
  func.func @transform_3(%arg0: i32) -> (i32, i32) {
    %c0_i32 = arith.constant 0 : i32
    %c0_i32_0 = arith.constant 0 : i32
    %c0_i32_1 = arith.constant 0 : i32
    return %c0_i32, %c0_i32_0 : i32, i32
  }
  func.func @transform_4(%arg0: i32) -> (i32, i32) {
    %c0_i32 = arith.constant 0 : i32
    %c0_i32_0 = arith.constant 0 : i32
    %c0_i32_1 = arith.constant 0 : i32
    return %c0_i32, %c0_i32_0 : i32, i32
  }
  func.func @transform_5(%arg0: i32) -> (i32, i32) {
    %c0_i32 = arith.constant 0 : i32
    %c0_i32_0 = arith.constant 0 : i32
    %c0_i32_1 = arith.constant 0 : i32
    return %c0_i32, %c0_i32_0 : i32, i32
  }
  func.func @transform_6(%arg0: i32) -> (i32, i32) {
    %c0_i32 = arith.constant 0 : i32
    %c0_i32_0 = arith.constant 0 : i32
    %c0_i32_1 = arith.constant 0 : i32
    return %c0_i32, %c0_i32_0 : i32, i32
  }
  func.func @transform_7(%arg0: i32) -> (i32, i32) {
    %c0_i32 = arith.constant 0 : i32
    %c0_i32_0 = arith.constant 0 : i32
    return %arg0, %c0_i32 : i32, i32
  }
}

</mosaic_0001>

<bundles_post_ra>
// kernel: mlp_regression_forward.1
= control target key start
LH: loop header
LB: loop body
LE: loop exit
PB: predicated region body
PF: predicated region fallthrough
CT: control target
= control target key end

     0   :  { %v441_v0 = vmov 0.0   ;;  %vm442_vm0 = vmmov 0   ;;  %vm54_vm1 = vcmask 261120   ;;  %vm324_vm2 = vcmask 7168   ;;  %s576_s1 = inlined_call_operand.vmem [shape: bf16[32,128], index: 1, kind: input, shape index: {}]   ;;  %s577_s0 = inlined_call_operand.vmem [shape: f32[8,32], index: 0, kind: input, shape index: {}]   ;;  %s578_s3 = inlined_call_operand.vmem [shape: bf16[128,128], index: 3, kind: input, shape index: {}]   ;;  %s579_s5 = inlined_call_operand.vmem [shape: bf16[128,1], index: 5, kind: input, shape index: {}]   ;;  %s580_s2 = inlined_call_operand.vmem [shape: f32[1,128], index: 2, kind: input, shape index: {}]   ;;  %s581_s6 = inlined_call_operand.<no memory space> [shape: f32[1,1], index: 6, kind: input, shape index: {}]   ;;  %s582_s4 = inlined_call_operand.vmem [shape: f32[1,128], index: 4, kind: input, shape index: {}]   ;;  %s583_s7 = inlined_call_operand.vmem [shape: f32[8,1], index: 7, kind: output, shape index: {}]  }
   0x1   :  { %373 = vmatprep.subr.bf16.mxu0 %v441_v0  ;;  %v423_v1 = vld [vmem:[%s576_s1 + $0x8] sm:$0xff]   ;;  %377 = vmatprep.mubr.msk.bf16.mxu0 %vm442_vm0, %v441_v0  ;;  %v424_v2 = vld [vmem:[%s576_s1] sm:$0xff]   ;;  %v425_v4 = vld [vmem:[%s578_s3 + $0x38] sm:$0xff]   ;;  %v12_v29 = vstv %s581_s6 }
   0x2   :  { %381 = vmatprep.subr.bf16.mxu1 %v441_v0  ;;  %397 = vmatprep.mubr.msk.bf16.mxu1 %vm442_vm0, %v441_v0  ;;  %v29_v3 = vld [vmem:[%s577_s0] sm:$0xff]  ;;  %v426_v6 = vld [vmem:[%s578_s3 + $0x30] sm:$0xff]   ;;  %v427_v7 = vld [vmem:[%s578_s3 + $0x28] sm:$0xff]   ;;  %13 = vst [vmem:[#allocation2] sm:$0x1] %v12_v29 }
   0x3   :  { %374 = vmatpush3.bf16.msra.mxu0 %v423_v1  ;;  %v30_v5 = vpack.c.bf16 %v29_v3, %v29_v3  ;;  %382 = vmatpush3.bf16.msra.mxu1 %v425_v4  ;;  %v428_v8 = vld [vmem:[%s578_s3 + $0x20] sm:$0xff]   ;;  %v429_v9 = vld [vmem:[%s578_s3 + $0x18] sm:$0xff]   ;;  %v430_v10 = vld [vmem:[%s578_s3 + $0x10] sm:$0xff]  }
   0x4   :  { %375 = vmatprep.subr.bf16.mxu0 %v441_v0  ;;  %383 = vmatprep.subr.bf16.mxu1 %v441_v0  ;;  %v431_v11 = vld [vmem:[%s578_s3 + $0x8] sm:$0xff]   ;;  %v432_v12 = vld [vmem:[%s578_s3] sm:$0xff]   ;;  %v433_v13 = vld [vmem:[%s579_s5 + $0x38] sm:$0xff]  }
   0x5   :  { %v434_v14 = vld [vmem:[%s579_s5 + $0x30] sm:$0xff]   ;;  %v435_v15 = vld [vmem:[%s579_s5 + $0x28] sm:$0xff]   ;;  %v436_v16 = vld [vmem:[%s579_s5 + $0x20] sm:$0xff]  }
   0x6   :  { %v437_v17 = vld [vmem:[%s579_s5 + $0x18] sm:$0xff]   ;;  %v438_v18 = vld [vmem:[%s579_s5 + $0x10] sm:$0xff]   ;;  %v330_v19 = vld [vmem:[%s580_s2] ss:$0 sm:$0xff] }
   0x7   :  { %376 = vmatpush3.bf16.msra.mxu0 %v424_v2  ;;  %384 = vmatpush3.bf16.msra.mxu1 %v426_v6  ;;  %v439_v27 = vld [vmem:[%s579_s5 + $0x8] sm:$0xff]   ;;  %v440_v28 = vld [vmem:[%s579_s5] sm:$0xff]  }
   0x8   :  { %401 = vmatprep.subr.bf16.mxu0 %v441_v0  ;;  %385 = vmatprep.subr.bf16.mxu1 %v441_v0  ;;  %v334_v30 = vld [vmem:[%s582_s4] ss:$0 sm:$0xff] }
   0x9   :  { %v343_v38 = vld [vmem:[#allocation2] ss:$0 sm:$0xff] }
   0xa   :  { %378 = vmatmul.mubr.msk.bf16.vlgmr.msra.gmra.mxu0 %vm54_vm1, %v30_v5 }
   0xb   :  { %417 = vmatprep.mubr.msk.bf16.mxu0 %vm442_vm0, %v441_v0  ;;  %386 = vmatpush3.bf16.msra.mxu1 %v427_v7 }
   0xc   :  { %387 = vmatprep.subr.bf16.mxu1 %v441_v0  ;;  %402 = vmatpush3.bf16.msra.mxu0 %v433_v13 }
   0xd   :  { %403 = vmatprep.subr.bf16.mxu0 %v441_v0 }
   0xf   :  { %388 = vmatpush3.bf16.msra.mxu1 %v428_v8 }
  0x10   :  { %389 = vmatprep.subr.bf16.mxu1 %v441_v0  ;;  %404 = vmatpush3.bf16.msra.mxu0 %v434_v14 }
  0x11   :  { %405 = vmatprep.subr.bf16.mxu0 %v441_v0 }
  0x13   :  { %390 = vmatpush3.bf16.msra.mxu1 %v429_v9 }
  0x14   :  { %391 = vmatprep.subr.bf16.mxu1 %v441_v0  ;;  %406 = vmatpush3.bf16.msra.mxu0 %v435_v15 }
  0x15   :  { %407 = vmatprep.subr.bf16.mxu0 %v441_v0 }
  0x17   :  { %392 = vmatpush3.bf16.msra.mxu1 %v430_v10 }
  0x18   :  { %393 = vmatprep.subr.bf16.mxu1 %v441_v0  ;;  %408 = vmatpush3.bf16.msra.mxu0 %v436_v16 }
  0x19   :  { %409 = vmatprep.subr.bf16.mxu0 %v441_v0 }
  0x1b   :  { %394 = vmatpush3.bf16.msra.mxu1 %v431_v11 }
  0x1c   :  { %395 = vmatprep.subr.bf16.mxu1 %v441_v0  ;;  %410 = vmatpush3.bf16.msra.mxu0 %v437_v17 }
  0x1d   :  { %411 = vmatprep.subr.bf16.mxu0 %v441_v0 }
  0x1f   :  { %396 = vmatpush3.bf16.msra.mxu1 %v432_v12 }
  0x20   :  { %412 = vmatpush3.bf16.msra.mxu0 %v438_v18 }
  0x21   :  { %413 = vmatprep.subr.bf16.mxu0 %v441_v0 }
  0x24   :  { %414 = vmatpush3.bf16.msra.mxu0 %v439_v27 }
  0x25   :  { %415 = vmatprep.subr.bf16.mxu0 %v441_v0 }
  0x28   :  { %416 = vmatpush3.bf16.msra.mxu0 %v440_v28 }
  0xca   :  { %v92_v20 = vpop.f32.mrf.mxu0 }
  0xcb   :  { %v93_v21 = vadd.f32 %v330_v19, %v92_v20 }
  0xcc   :  { %v379_v22 = vpop.f32.mrf.mxu0 }
  0xcd   :  { %v98_v23 = vmax.f32 %v93_v21, 0.0 }
  0xce   :  { %v95_v24 = vpop.f32.mrf.mxu0 }
  0xcf   :  { %v99_v25 = vpack.c.bf16 %v98_v23, %v98_v23 }
  0xd0   :  { %v380_v26 = vpop.f32.mrf.mxu0 }
  0xd1   :  { %398 = vmatmul.mubr.bf16.vlgmr.msra.gmra.mxu1 %v99_v25 }
 0x191   :  { %v205_v31 = vpop.f32.mrf.mxu1 }
 0x192   :  { %v206_v32 = vadd.f32 %v334_v30, %v205_v31 }
 0x193   :  { %v399_v33 = vpop.f32.mrf.mxu1 }
 0x194   :  { %v211_v34 = vmax.f32 %v206_v32, 0.0 }
 0x195   :  { %v208_v35 = vpop.f32.mrf.mxu1 }
 0x196   :  { %v212_v36 = vpack.c.bf16 %v211_v34, %v211_v34 }
 0x197   :  { %v400_v37 = vpop.f32.mrf.mxu1 }
 0x198   :  { %418 = vmatmul.mubr.bf16.vlgmr.msra.gmra.mxu0 %v212_v36 }
 0x258   :  { %v318_v39 = vpop.f32.mrf.mxu0 }
 0x259   :  { %v319_v40 = vadd.f32 %v343_v38, %v318_v39 }
 0x25a   :  { %v419_v41 = vpop.f32.mrf.mxu0 }
 0x25b   :  { %325 = vst.msk [vmem:[%s583_s7] sm:$0xff] %vm324_vm2, %v319_v40 }
 0x25c   :  { %v321_v42 = vpop.f32.mrf.mxu0 }
 0x25e   :  { %v420_v43 = vpop.f32.mrf.mxu0 }

</bundles_post_ra>
